<compile_context>
chip_gen: v6e
topology: v6e:2x2x1
jax: 0.10.0
libtpu: 0.0.40
codegen_flags: <defaults>
</compile_context>

<pallas_src>
import jax
import jax.numpy as jnp
from jax.experimental import pallas as pl
from jax.experimental.pallas import tpu as pltpu

LANES = 128
SUBLANES = 8
TARGET_BLOCK_BYTES = 1 << 20  # ~1 MiB per input block per grid step.


def _round_up(x, m):
    return ((x + m - 1) // m) * m


def _make_sse_kernel(tile_rows, valid_rows, needs_mask):
    """Per-block sum-of-squared-errors partial reduction.

    p_ref, t_ref : (tile_rows, 128) VMEM tiles (pred, target), native dtype
    out_ref      : (1, 8, 128) f32 partial-sum vreg for this block
    """

    def kernel(p_ref, t_ref, out_ref):
        d = p_ref[...].astype(jnp.float32) - t_ref[...].astype(jnp.float32)
        dd = d * d
        if needs_mask:
            # Only the last block can be partial; jnp.where *selects*, so any
            # unspecified/NaN data in the out-of-bounds rows is dropped.
            row = jax.lax.broadcasted_iota(jnp.int32, (tile_rows, LANES), 0)
            global_row = pl.program_id(0) * tile_rows + row
            dd = jnp.where(global_row < valid_rows, dd, 0.0)
        # Pure-VPU leading-axis reduction down to one (8, 128) vreg.
        partial = jnp.sum(dd.reshape(tile_rows // SUBLANES, SUBLANES, LANES), axis=0)
        out_ref[...] = partial[None]

    return kernel


def reconstruction_loss(pred, target):
    """Pallas equivalent of torch.sum((pred - target) ** 2). Returns f32 scalar."""
    assert pred.shape == target.shape, (pred.shape, target.shape)
    n = int(pred.size)
    if n == 0:
        return jnp.zeros((), jnp.float32)

    p = pred.reshape(-1)
    t = target.reshape(-1)

    rows = -(-n // LANES)  # ceil-div
    rem = rows * LANES - n
    if rem:
        # <=127 zeros so the (rows, 128) view exists; (0 - 0)^2 contributes 0.
        p = jnp.pad(p, (0, rem))
        t = jnp.pad(t, (0, rem))
    p2 = p.reshape(rows, LANES)
    t2 = t.reshape(rows, LANES)

    # Byte-based tile sizing: ~1 MiB per input block regardless of dtype.
    itemsize = p2.dtype.itemsize
    target_rows = max(32, TARGET_BLOCK_BYTES // (LANES * itemsize))
    tile_rows = min(target_rows, _round_up(rows, 32))  # 32: safe for int8/fp8 packing
    num_blocks = -(-rows // tile_rows)
    needs_mask = num_blocks * tile_rows != rows

    tile_spec = pl.BlockSpec((tile_rows, LANES), lambda i: (i, 0))
    out_spec = pl.BlockSpec((1, SUBLANES, LANES), lambda i: (i, 0, 0))

    cost = pl.CostEstimate(
        flops=3 * n,
        transcendentals=0,
        bytes_accessed=2 * rows * LANES * itemsize + num_blocks * SUBLANES * LANES * 4,
    )

    partials = pl.pallas_call(
        _make_sse_kernel(tile_rows, rows, needs_mask),
        out_shape=jax.ShapeDtypeStruct((num_blocks, SUBLANES, LANES), jnp.float32),
        grid_spec=pltpu.PrefetchScalarGridSpec(
            num_scalar_prefetch=0,
            grid=(num_blocks,),
            in_specs=[tile_spec, tile_spec],
            out_specs=out_spec,
        ),
        compiler_params=pltpu.CompilerParams(
            # Independent per-block partial sums: sharded across both
            # TensorCores on v7x; no-op on single-core v5e/v6e.
            dimension_semantics=("parallel",),
        ),
        cost_estimate=cost,
    )(p2, t2)

    # Tiny (<=0.5% of input bytes) final reduce of the per-block partial sums.
    return jnp.sum(partials)


def _reference_loss(pred, target):
    d = pred.astype(jnp.float32) - target.astype(jnp.float32)
    return jnp.sum(d * d)


if __name__ == "__main__":
    key = jax.random.PRNGKey(0)
    k1, k2, k3, k4 = jax.random.split(key, 4)

    # NCHW: batch=2, channels=4, spatial=16x16
    pred = jax.random.normal(k1, (2, 4, 16, 16), dtype=jnp.float32)
    target = jax.random.normal(k2, (2, 4, 16, 16), dtype=jnp.float32)

    loss = jax.block_until_ready(reconstruction_loss(pred, target))
    ref = jax.block_until_ready(_reference_loss(pred, target))
    assert jnp.allclose(loss, ref, rtol=1e-5, atol=1e-5), (loss, ref)

    # Exercise the non-multiple-of-128 path + in-kernel tail mask.
    p_odd = jax.random.normal(k3, (3, 5, 7, 11), dtype=jnp.float32)
    t_odd = jax.random.normal(k4, (3, 5, 7, 11), dtype=jnp.float32)
    loss_odd = jax.block_until_ready(reconstruction_loss(p_odd, t_odd))
    ref_odd = jax.block_until_ready(_reference_loss(p_odd, t_odd))
    assert jnp.allclose(loss_odd, ref_odd, rtol=1e-5, atol=1e-5), (loss_odd, ref_odd)

    print("KERNEL_OK")
</pallas_src>

<mosaic_0001>
module attributes {stable_mosaic.version = 11 : i64} {
  func.func @kernel(%arg0: i32, %arg1: memref<32x128xf32, #tpu.memory_space<vmem>>, %arg2: memref<32x128xf32, #tpu.memory_space<vmem>>, %arg3: memref<1x8x128xf32, #tpu.memory_space<vmem>>) attributes {dimension_semantics = [#tpu.dimension_semantics<parallel>], iteration_bounds = array<i64: 1>, scalar_prefetch = 0 : i64, scratch_operands = 0 : i64, tpu.core_type = #tpu.core_type<tc>, window_params = [{transform_indices = @transform_0, window_bounds = array<i64: 32, 128>}, {transform_indices = @transform_1, window_bounds = array<i64: 32, 128>}, {transform_indices = @transform_2, window_bounds = array<i64: 1, 8, 128>}]} {
    %c0 = arith.constant 0 : index
    %c0_0 = arith.constant 0 : index
    %0 = vector.load %arg1[%c0, %c0_0] : memref<32x128xf32, #tpu.memory_space<vmem>>, vector<32x128xf32>
    %c0_1 = arith.constant 0 : index
    %c0_2 = arith.constant 0 : index
    %1 = vector.load %arg2[%c0_1, %c0_2] : memref<32x128xf32, #tpu.memory_space<vmem>>, vector<32x128xf32>
    %2 = arith.subf %0, %1 : vector<32x128xf32>
    %3 = arith.mulf %2, %2 : vector<32x128xf32>
    %4 = tpu.iota {dimensions = array<i32: 0>} : vector<32x128xi32>
    %c32_i32 = arith.constant 32 : i32
    %5 = arith.muli %arg0, %c32_i32 : i32
    %6 = vector.broadcast %5 : i32 to vector<32x128xi32>
    %7 = arith.addi %6, %4 : vector<32x128xi32>
    %c16_i32 = arith.constant 16 : i32
    %8 = vector.broadcast %c16_i32 : i32 to vector<32x128xi32>
    %9 = arith.cmpi slt, %7, %8 : vector<32x128xi32>
    %cst = arith.constant 0.000000e+00 : f32
    %10 = vector.broadcast %cst : f32 to vector<32x128xf32>
    %11 = arith.select %9, %3, %10 : vector<32x128xi1>, vector<32x128xf32>
    %12 = vector.shape_cast %11 : vector<32x128xf32> to vector<4x8x128xf32>
    %cst_3 = arith.constant dense<0.000000e+00> : vector<8x128xf32>
    %13 = vector.multi_reduction <add>, %12, %cst_3 [0] : vector<4x8x128xf32> to vector<8x128xf32>
    %14 = vector.shape_cast %13 : vector<8x128xf32> to vector<1x8x128xf32>
    %c0_4 = arith.constant 0 : index
    %c0_5 = arith.constant 0 : index
    %c0_6 = arith.constant 0 : index
    %15 = vector.load %arg3[%c0_4, %c0_5, %c0_6] : memref<1x8x128xf32, #tpu.memory_space<vmem>>, vector<1x8x128xf32>
    tpu.vector_store %arg3[%c0_4, %c0_5, %c0_6], %14 {strides = array<i32>} : memref<1x8x128xf32, #tpu.memory_space<vmem>>, vector<1x8x128xf32>,
    return
  }
  func.func @transform_0(%arg0: i32) -> (i32, i32) {
    %c0_i32 = arith.constant 0 : i32
    %c0_i32_0 = arith.constant 0 : i32
    return %arg0, %c0_i32 : i32, i32
  }
  func.func @transform_1(%arg0: i32) -> (i32, i32) {
    %c0_i32 = arith.constant 0 : i32
    %c0_i32_0 = arith.constant 0 : i32
    return %arg0, %c0_i32 : i32, i32
  }
  func.func @transform_2(%arg0: i32) -> (i32, i32, i32) {
    %c0_i32 = arith.constant 0 : i32
    %c0_i32_0 = arith.constant 0 : i32
    %c0_i32_1 = arith.constant 0 : i32
    return %arg0, %c0_i32, %c0_i32_0 : i32, i32, i32
  }
}

</mosaic_0001>

<bundles_post_ra>
// kernel: tpu_custom_call.1
= control target key start
LH: loop header
LB: loop body
LE: loop exit
PB: predicated region body
PF: predicated region fallthrough
CT: control target
= control target key end

     0   :  { %7 = vsyncpa [#allocation3], 0  ;;  %s195_s0 = inlined_call_operand.hbm [shape: f32[16,128], index: 0, kind: input, shape index: {}]   ;;  %s196_s1 = inlined_call_operand.hbm [shape: f32[16,128], index: 1, kind: input, shape index: {}]   ;;  %s197_s2 = inlined_call_operand.hbm [shape: f32[1,8,128], index: 2, kind: output, shape index: {}]  }
   0x1   :  { %8 = vsyncpa [#allocation6], 0 }
   0x2   :  { %9 = vsyncpa [#allocation4], 0 }
   0x3   :  { %14 = vsyncadd [#allocation3], 256  ;;  %s166_s9 = smov [#allocation2]  }
   0x4   :  { %s15_s10 = sshll.u32 %s166_s9, 4  ;;  %s16_s10 = int_to_ptr.vmem [resolvable:$true] %s15_s10 }
   0x5   :  { %s108_s11 = scalar_lea.vmem %s16_s10, 256  ;;  %s112_s12 = scalar_lea.vmem %s16_s10, 512 }
   0x6   :  { %p109_p0 = scmp.ne.s32.totalorder %s16_s10, %s108_s11  ;;  %p113_p1 = scmp.lt.s32.totalorder %s16_s10, %s16_s10 }
   0x7   :  { %p114_p2 = scmp.lt.s32.totalorder %s112_s12, %s108_s11 }
   0x9   :  { %p115_p3 = por %p114_p2, %p113_p1 }
   0xb   :  { %p116_p4 = pnand %p115_p3, %p109_p0 }
   0xd   :  { %119 = shalt.err (!%p116_p4)
}
   0xe   :  { %s167_s13 = smov 128   ;;  %s168_s14 = smov 8  }
   0xf   :  { %21 = dma.hbm_to_vmem [thread:$0]  %s195_s0, 256, %s16_s10, [#allocation3], %s167_s13, %s167_s13, %s168_s14  }
  0x10   :  { %26 = vsyncadd [#allocation6], 256  ;;  %s169_s17 = smov [#allocation5]  }
  0x11   :  { %s27_s18 = sshll.u32 %s169_s17, 4  ;;  %s28_s18 = int_to_ptr.vmem [resolvable:$true] %s27_s18 }
  0x12   :  { %s128_s19 = scalar_lea.vmem %s28_s18, 256  ;;  %s132_s20 = scalar_lea.vmem %s28_s18, 512 }
  0x13   :  { %p129_p5 = scmp.ne.s32.totalorder %s28_s18, %s128_s19  ;;  %p133_p6 = scmp.lt.s32.totalorder %s28_s18, %s28_s18 }
  0x14   :  { %p134_p7 = scmp.lt.s32.totalorder %s132_s20, %s128_s19 }
  0x16   :  { %p135_p8 = por %p134_p7, %p133_p6 }
  0x18   :  { %p136_p9 = pnand %p135_p8, %p129_p5 }
  0x1a   :  { %139 = shalt.err (!%p136_p9)
}
  0x1b   :  { %33 = dma.hbm_to_vmem [thread:$0]  %s196_s1, 256, %s28_s18, [#allocation6], %s167_s13, %s167_s13, %s168_s14  }
  0x1c   :  { %160 = dma.done.wait [#allocation3], 512  }
  0x1d   :  { %161 = vsyncadd [#allocation3], 4294966784 }
  0x1e   :  { %162 = dma.done.wait [#allocation6], 512  }
  0x1f   :  { %163 = vsyncadd [#allocation6], 4294966784  ;;  %v40_v0 = vld [vmem:[#allocation2] sm:$0xff]  ;;  %v41_v1 = vld [vmem:[#allocation2 + $0x8] sm:$0xff]  ;;  %s170_s0 = smov [#allocation7]  }
  0x20   :  { %v44_v2 = vld [vmem:[#allocation5] sm:$0xff]  ;;  %v45_v3 = vld [vmem:[#allocation5 + $0x8] sm:$0xff]  ;;  %s85_s23 = sshll.u32 %s170_s0, 4  ;;  %s86_s23 = int_to_ptr.vmem [resolvable:$true] %s85_s23 }
  0x21   :  { %v48_v4 = vsub.f32 %v40_v0, %v44_v2  ;;  %v49_v5 = vsub.f32 %v41_v1, %v45_v3  ;;  %s140_s24 = scalar_lea.vmem %s86_s23, 128  ;;  %p145_p11 = scmp.lt.s32.totalorder %s86_s23, %s86_s23 }
  0x22   :  { %p141_p10 = scmp.ne.s32.totalorder %s86_s23, %s140_s24  ;;  %p146_p12 = scmp.lt.s32.totalorder %s140_s24, %s140_s24 }
  0x23   :  { %v52_v6 = vmul.f32 %v48_v4, %v48_v4  ;;  %v53_v7 = vmul.f32 %v49_v5, %v49_v5 }
  0x24   :  { %p147_p13 = por %p146_p12, %p145_p11 }
  0x25   :  { %v75_v8 = vadd.f32 %v53_v7, %v52_v6 }
  0x26   :  { %p148_p0 = pnand %p147_p13, %p141_p10 }
  0x27   :  { %78 = vst [vmem:[#allocation7] sm:$0xff] %v75_v8 }
  0x28   :  { %151 = shalt.err (!%p148_p0)
}
  0x29   :  { %88 = dma.vmem_to_hbm [thread:$0]  %s86_s23, 128, %s197_s2, [#allocation4]  }
  0x2a   :  { %164 = dma.done.wait [#allocation4], 128  }
  0x2b   :  { %165 = vsyncadd [#allocation4], 4294967168 }
  0x2c   :  { %92 = vsyncpa [#allocation3], 1 }
  0x2d   :  { %93 = vsyncpa [#allocation6], 1 }
  0x2e   :  { %94 = vsyncpa [#allocation4], 1 }

</bundles_post_ra>
